<compile_context>
chip_gen: v6e
topology: v6e:2x2x1
jax: 0.10.0
libtpu: 0.0.40
codegen_flags: <defaults>
</compile_context>

<pallas_src>
import jax
import jax.numpy as jnp
from jax.experimental import pallas as pl
from jax.experimental.pallas import tpu as pltpu


def _self_attn_kernel(xfull_ref, xq_ref, wq_ref, bq_ref, wk_ref, bk_ref,
                      wv_ref, bv_ref, gamma_ref, out_ref, attn_ref,
                      kT_sc, vT_sc):
    qi = pl.program_id(1)

    # ---- per-batch prologue: K^T and V^T from the full (C, N) feature map ----
    @pl.when(qi == 0)
    def _():
        xb = xfull_ref[0].astype(jnp.bfloat16)                       # (C, N)
        kT = jnp.dot(wk_ref[...], xb,
                     preferred_element_type=jnp.float32) + bk_ref[...]   # (dk, N)
        vT = jnp.dot(wv_ref[...], xb,
                     preferred_element_type=jnp.float32) + bv_ref[...]   # (C,  N)
        kT_sc[...] = kT.astype(kT_sc.dtype)
        vT_sc[...] = vT.astype(vT_sc.dtype)

    # ---- Q for this query tile ----------------------------------------------
    x_q = xq_ref[0]                                                  # (C, TQ) f32
    qT = jnp.dot(wq_ref[...], x_q.astype(jnp.bfloat16),
                 preferred_element_type=jnp.float32) + bq_ref[...]   # (dk, TQ)

    # energy[i, j] = sum_d qT[d, i] * kT[d, j]  (contract dim 0 of both;
    # no explicit transpose of K is materialized)
    energy = jax.lax.dot_general(
        qT.astype(jnp.bfloat16), kT_sc[...],
        dimension_numbers=(((0,), (0,)), ((), ())),
        preferred_element_type=jnp.float32)                          # (TQ, N)

    # ---- row softmax (full rows present; fp32 on VPU, rcp on EUP) ------------
    m = jnp.max(energy, axis=-1, keepdims=True)
    e = jnp.exp(energy - m)
    attn = e * pl.reciprocal(jnp.sum(e, axis=-1, keepdims=True), approx=True)
    attn_ref[0] = attn.astype(attn_ref.dtype)

    # out^T[c, i] = sum_j vT[c, j] * attn[i, j]
    outT = jax.lax.dot_general(
        vT_sc[...], attn.astype(jnp.bfloat16),
        dimension_numbers=(((1,), (1,)), ((), ())),
        preferred_element_type=jnp.float32)                          # (C, TQ)

    gamma = gamma_ref[0]                                             # SMEM scalar
    out_ref[0] = (gamma * outT + x_q).astype(out_ref.dtype)


def _pick_q_tile(n, attn_tile_budget_bytes=8 * 1024 * 1024):
    """Largest multiple-of-128 divisor of n whose double-buffered (TQ, n) fp32
    attention tile fits the budget; falls back to n if n is not 128-aligned."""
    if n % 128 != 0:
        return n
    best = 128
    tq = 128
    while tq <= n:
        if n % tq == 0 and 2 * tq * n * 4 <= attn_tile_budget_bytes:
            best = tq
        tq += 128
    return best


def self_attn_spatial(x, wq, bq, wk, bk, wv, bv, gamma, q_tile=None):
    """DANet spatial self-attention.

    x:  (B, C, W, H) NCHW input (matches the PyTorch module)
    wq/wk: (dk, C),  bq/bk: (dk, 1)   -- query/key 1x1 conv weight & bias
    wv:    (C,  C),  bv:    (C,  1)   -- value 1x1 conv weight & bias
    gamma: (1,)                       -- residual scale
    Returns (out: (B, C, W, H), attention: (B, N, N)) with N = W * H.
    """
    B, C, W, H = x.shape
    N = W * H
    dk = wq.shape[0]

    x_cf = x.reshape(B, C, N)                    # pure reshape, no transpose
    tq = q_tile if q_tile is not None else _pick_q_tile(N)
    assert N % tq == 0, "q_tile must divide W*H"
    n_qt = N // tq

    # bf16 MXU feed for the weights (fp32 accumulation inside the kernel)
    wq_b = wq.astype(jnp.bfloat16)
    wk_b = wk.astype(jnp.bfloat16)
    wv_b = wv.astype(jnp.bfloat16)

    full = lambda b, q: (0, 0)

    out_cf, attn = pl.pallas_call(
        _self_attn_kernel,
        out_shape=(
            jax.ShapeDtypeStruct((B, C, N), x.dtype),
            jax.ShapeDtypeStruct((B, N, N), jnp.float32),
        ),
        grid_spec=pltpu.PrefetchScalarGridSpec(
            num_scalar_prefetch=0,
            grid=(B, n_qt),
            in_specs=[
                pl.BlockSpec((1, C, N), lambda b, q: (b, 0, 0)),    # full x (K/V)
                pl.BlockSpec((1, C, tq), lambda b, q: (b, 0, q)),   # x query tile
                pl.BlockSpec((dk, C), full),                        # Wq (bf16)
                pl.BlockSpec((dk, 1), full),                        # bq
                pl.BlockSpec((dk, C), full),                        # Wk (bf16)
                pl.BlockSpec((dk, 1), full),                        # bk
                pl.BlockSpec((C, C), full),                         # Wv (bf16)
                pl.BlockSpec((C, 1), full),                         # bv
                pl.BlockSpec(memory_space=pltpu.MemorySpace.SMEM),  # gamma
            ],
            out_specs=[
                pl.BlockSpec((1, C, tq), lambda b, q: (b, 0, q)),   # out (chan-first)
                pl.BlockSpec((1, tq, N), lambda b, q: (b, q, 0)),   # attention
            ],
            scratch_shapes=[
                pltpu.VMEM((dk, N), jnp.bfloat16),   # K^T, resident per batch
                pltpu.VMEM((C, N), jnp.bfloat16),    # V^T, resident per batch
            ],
        ),
        compiler_params=pltpu.CompilerParams(
            dimension_semantics=("parallel", "arbitrary"),
            vmem_limit_bytes=32 * 1024 * 1024,
        ),
    )(x_cf, x_cf, wq_b, bq, wk_b, bk, wv_b, bv, gamma)

    out = out_cf.reshape(B, C, W, H)
    return out, attn


def _reference(x, wq, bq, wk, bk, wv, bv, gamma):
    """Pure-JAX fp32 reference mirroring the PyTorch forward exactly."""
    B, C, W, H = x.shape
    N = W * H
    xf = x.reshape(B, C, N).astype(jnp.float32)                  # (B, C, N)
    q = jnp.einsum('dc,bcn->bdn', wq, xf) + bq[None]             # (B, dk, N)
    k = jnp.einsum('dc,bcn->bdn', wk, xf) + bk[None]             # (B, dk, N)
    v = jnp.einsum('oc,bcn->bon', wv, xf) + bv[None]             # (B, C, N)
    energy = jnp.einsum('bdi,bdj->bij', q, k)                    # (B, N, N)
    attn = jax.nn.softmax(energy, axis=-1)
    out = jnp.einsum('bcj,bij->bci', v, attn)                    # (B, C, N)
    out = gamma[0] * out + xf
    return out.reshape(B, C, W, H).astype(x.dtype), attn


if __name__ == "__main__":
    # Small shapes consistent with the module: B=2, in_dim=8, W=H=16, out_dim=4
    B, C, W, H = 2, 8, 16, 16
    out_dim = 4
    N = W * H

    key = jax.random.PRNGKey(0)
    kx, kq, kk, kv, kbq, kbk, kbv = jax.random.split(key, 7)

    x = jax.random.normal(kx, (B, C, W, H), dtype=jnp.float32)

    # 1x1 conv parameters in torch layout (out_channels, in_channels); biases
    # as column vectors so they broadcast over the spatial axis in the kernel.
    wq = jax.random.normal(kq, (out_dim, C), dtype=jnp.float32) * 0.1
    wk = jax.random.normal(kk, (out_dim, C), dtype=jnp.float32) * 0.1
    wv = jax.random.normal(kv, (C, C), dtype=jnp.float32) * 0.1
    bq = jax.random.normal(kbq, (out_dim, 1), dtype=jnp.float32) * 0.1
    bk = jax.random.normal(kbk, (out_dim, 1), dtype=jnp.float32) * 0.1
    bv = jax.random.normal(kbv, (C, 1), dtype=jnp.float32) * 0.1
    # nn.Parameter(torch.zeros(1)) initializes gamma to 0; use 0.5 here so the
    # residual-scale path is actually exercised.
    gamma = jnp.full((1,), 0.5, dtype=jnp.float32)

    # q_tile=128 -> two query tiles per batch element, exercising the tiled path.
    out, attn = self_attn_spatial(x, wq, bq, wk, bk, wv, bv, gamma, q_tile=128)
    jax.block_until_ready((out, attn))

    ref_out, ref_attn = _reference(x, wq, bq, wk, bk, wv, bv, gamma)
    assert out.shape == (B, C, W, H) and attn.shape == (B, N, N)
    # bf16 MXU operands + approx reciprocal => slightly looser tolerance than a
    # pure-fp32 pipeline; fp32 accumulation keeps errors well inside these.
    assert jnp.allclose(attn, ref_attn, atol=2e-3, rtol=2e-2)
    assert jnp.allclose(out, ref_out, atol=1e-2, rtol=1e-2)

    print("KERNEL_OK")
</pallas_src>

<mosaic_0001>
module attributes {stable_mosaic.version = 11 : i64} {
  func.func @_self_attn_kernel(%arg0: i32, %arg1: i32, %arg2: memref<1x8x256xf32, #tpu.memory_space<vmem>>, %arg3: memref<1x8x128xf32, #tpu.memory_space<vmem>>, %arg4: memref<4x8xbf16, #tpu.memory_space<vmem>>, %arg5: memref<4x1xf32, #tpu.memory_space<vmem>>, %arg6: memref<4x8xbf16, #tpu.memory_space<vmem>>, %arg7: memref<4x1xf32, #tpu.memory_space<vmem>>, %arg8: memref<8x8xbf16, #tpu.memory_space<vmem>>, %arg9: memref<8x1xf32, #tpu.memory_space<vmem>>, %arg10: memref<1xf32, #tpu.memory_space<smem>>, %arg11: memref<1x8x128xf32, #tpu.memory_space<vmem>>, %arg12: memref<1x128x256xf32, #tpu.memory_space<vmem>>, %arg13: memref<4x256xbf16, #tpu.memory_space<vmem>>, %arg14: memref<8x256xbf16, #tpu.memory_space<vmem>>) attributes {dimension_semantics = [#tpu.dimension_semantics<parallel>, #tpu.dimension_semantics<arbitrary>], iteration_bounds = array<i64: 2, 2>, scalar_prefetch = 0 : i64, scratch_operands = 2 : i64, tpu.core_type = #tpu.core_type<tc>, window_params = [{transform_indices = @transform_0, window_bounds = array<i64: 1, 8, 256>}, {transform_indices = @transform_1, window_bounds = array<i64: 1, 8, 128>}, {pipeline_mode = #tpu.pipeline_mode<synchronous>, transform_indices = @transform_2, window_bounds = array<i64: 4, 8>}, {pipeline_mode = #tpu.pipeline_mode<synchronous>, transform_indices = @transform_3, window_bounds = array<i64: 4, 1>}, {pipeline_mode = #tpu.pipeline_mode<synchronous>, transform_indices = @transform_4, window_bounds = array<i64: 4, 8>}, {pipeline_mode = #tpu.pipeline_mode<synchronous>, transform_indices = @transform_5, window_bounds = array<i64: 4, 1>}, {pipeline_mode = #tpu.pipeline_mode<synchronous>, transform_indices = @transform_6, window_bounds = array<i64: 8, 8>}, {pipeline_mode = #tpu.pipeline_mode<synchronous>, transform_indices = @transform_7, window_bounds = array<i64: 8, 1>}, {transform_indices = @transform_8, window_bounds = array<i64: 1>}, {transform_indices = @transform_9, window_bounds = array<i64: 1, 8, 128>}, {transform_indices = @transform_10, window_bounds = array<i64: 1, 128, 256>}]} {
    %c0_i32 = arith.constant 0 : i32
    %0 = arith.cmpi eq, %arg1, %c0_i32 : i32
    %1 = arith.extui %0 : i1 to i32
    %c0_i32_0 = arith.constant 0 : i32
    %2 = arith.cmpi ne, %1, %c0_i32_0 : i32
    scf.if %2 {
      %c0_22 = arith.constant 0 : index
      %c0_23 = arith.constant 0 : index
      %c0_24 = arith.constant 0 : index
      %37 = vector.load %arg2[%c0_22, %c0_23, %c0_24] : memref<1x8x256xf32, #tpu.memory_space<vmem>>, vector<1x8x256xf32>
      %38 = vector.shape_cast %37 : vector<1x8x256xf32> to vector<8x256xf32>
      %39 = arith.truncf %38 : vector<8x256xf32> to vector<8x256xbf16>
      %c0_25 = arith.constant 0 : index
      %c0_26 = arith.constant 0 : index
      %40 = vector.load %arg6[%c0_25, %c0_26] : memref<4x8xbf16, #tpu.memory_space<vmem>>, vector<4x8xbf16>
      %cst_27 = arith.constant dense<0.000000e+00> : vector<4x256xf32>
      %41 = tpu.matmul %40, %39, %cst_27 {dimension_numbers = #tpu.dot_dimension_numbers<[1], [0], [0], [1], [0, 0, 1, 1], [], []>} : vector<4x8xbf16>, vector<8x256xbf16>, vector<4x256xf32> -> vector<4x256xf32>
      %c0_28 = arith.constant 0 : index
      %c0_29 = arith.constant 0 : index
      %42 = vector.load %arg7[%c0_28, %c0_29] : memref<4x1xf32, #tpu.memory_space<vmem>>, vector<4x1xf32>
      %43 = vector.broadcast %42 : vector<4x1xf32> to vector<4x256xf32>
      %44 = arith.addf %41, %43 : vector<4x256xf32>
      %c0_30 = arith.constant 0 : index
      %c0_31 = arith.constant 0 : index
      %45 = vector.load %arg8[%c0_30, %c0_31] : memref<8x8xbf16, #tpu.memory_space<vmem>>, vector<8x8xbf16>
      %cst_32 = arith.constant dense<0.000000e+00> : vector<8x256xf32>
      %46 = tpu.matmul %45, %39, %cst_32 {dimension_numbers = #tpu.dot_dimension_numbers<[1], [0], [0], [1], [0, 0, 1, 1], [], []>} : vector<8x8xbf16>, vector<8x256xbf16>, vector<8x256xf32> -> vector<8x256xf32>
      %c0_33 = arith.constant 0 : index
      %c0_34 = arith.constant 0 : index
      %47 = vector.load %arg9[%c0_33, %c0_34] : memref<8x1xf32, #tpu.memory_space<vmem>>, vector<8x1xf32>
      %48 = vector.broadcast %47 : vector<8x1xf32> to vector<8x256xf32>
      %49 = arith.addf %46, %48 : vector<8x256xf32>
      %50 = arith.truncf %44 : vector<4x256xf32> to vector<4x256xbf16>
      %c0_35 = arith.constant 0 : index
      %c0_36 = arith.constant 0 : index
      %51 = vector.load %arg13[%c0_35, %c0_36] : memref<4x256xbf16, #tpu.memory_space<vmem>>, vector<4x256xbf16>
      tpu.vector_store %arg13[%c0_35, %c0_36], %50 {strides = array<i32>} : memref<4x256xbf16, #tpu.memory_space<vmem>>, vector<4x256xbf16>,
      %52 = arith.truncf %49 : vector<8x256xf32> to vector<8x256xbf16>
      %c0_37 = arith.constant 0 : index
      %c0_38 = arith.constant 0 : index
      %53 = vector.load %arg14[%c0_37, %c0_38] : memref<8x256xbf16, #tpu.memory_space<vmem>>, vector<8x256xbf16>
      tpu.vector_store %arg14[%c0_37, %c0_38], %52 {strides = array<i32>} : memref<8x256xbf16, #tpu.memory_space<vmem>>, vector<8x256xbf16>,
    } else {
    }
    %c0 = arith.constant 0 : index
    %c0_1 = arith.constant 0 : index
    %c0_2 = arith.constant 0 : index
    %3 = vector.load %arg3[%c0, %c0_1, %c0_2] : memref<1x8x128xf32, #tpu.memory_space<vmem>>, vector<1x8x128xf32>
    %4 = vector.shape_cast %3 : vector<1x8x128xf32> to vector<8x128xf32>
    %c0_3 = arith.constant 0 : index
    %c0_4 = arith.constant 0 : index
    %5 = vector.load %arg4[%c0_3, %c0_4] : memref<4x8xbf16, #tpu.memory_space<vmem>>, vector<4x8xbf16>
    %6 = arith.truncf %4 : vector<8x128xf32> to vector<8x128xbf16>
    %cst = arith.constant dense<0.000000e+00> : vector<4x128xf32>
    %7 = tpu.matmul %5, %6, %cst {dimension_numbers = #tpu.dot_dimension_numbers<[1], [0], [0], [1], [0, 0, 1, 1], [], []>} : vector<4x8xbf16>, vector<8x128xbf16>, vector<4x128xf32> -> vector<4x128xf32>
    %c0_5 = arith.constant 0 : index
    %c0_6 = arith.constant 0 : index
    %8 = vector.load %arg5[%c0_5, %c0_6] : memref<4x1xf32, #tpu.memory_space<vmem>>, vector<4x1xf32>
    %9 = vector.broadcast %8 : vector<4x1xf32> to vector<4x128xf32>
    %10 = arith.addf %7, %9 : vector<4x128xf32>
    %11 = arith.truncf %10 : vector<4x128xf32> to vector<4x128xbf16>
    %c0_7 = arith.constant 0 : index
    %c0_8 = arith.constant 0 : index
    %12 = vector.load %arg13[%c0_7, %c0_8] : memref<4x256xbf16, #tpu.memory_space<vmem>>, vector<4x256xbf16>
    %cst_9 = arith.constant dense<0.000000e+00> : vector<128x256xf32>
    %13 = tpu.matmul %11, %12, %cst_9 {dimension_numbers = #tpu.dot_dimension_numbers<[0], [0], [1], [1], [0, 1, 1, 1], [], []>} : vector<4x128xbf16>, vector<4x256xbf16>, vector<128x256xf32> -> vector<128x256xf32>
    %cst_10 = arith.constant dense<0xFF800000> : vector<128xf32>
    %14 = vector.multi_reduction <maximumf>, %13, %cst_10 [1] : vector<128x256xf32> to vector<128xf32>
    %15 = vector.shape_cast %14 : vector<128xf32> to vector<128x1xf32>
    %16 = vector.broadcast %15 : vector<128x1xf32> to vector<128x256xf32>
    %17 = arith.subf %13, %16 : vector<128x256xf32>
    %18 = math.exp %17 : vector<128x256xf32>
    %cst_11 = arith.constant dense<0.000000e+00> : vector<128xf32>
    %19 = vector.multi_reduction <add>, %18, %cst_11 [1] : vector<128x256xf32> to vector<128xf32>
    %20 = vector.shape_cast %19 : vector<128xf32> to vector<128x1xf32>
    %21 = tpu.reciprocal %20 {approx = true} : vector<128x1xf32> -> vector<128x1xf32>
    %22 = vector.broadcast %21 : vector<128x1xf32> to vector<128x256xf32>
    %23 = arith.mulf %18, %22 : vector<128x256xf32>
    %c0_12 = arith.constant 0 : index
    %c0_13 = arith.constant 0 : index
    %c0_14 = arith.constant 0 : index
    %24 = vector.load %arg12[%c0_12, %c0_13, %c0_14] : memref<1x128x256xf32, #tpu.memory_space<vmem>>, vector<1x128x256xf32>
    %25 = vector.shape_cast %24 : vector<1x128x256xf32> to vector<128x256xf32>
    %26 = vector.shape_cast %23 : vector<128x256xf32> to vector<1x128x256xf32>
    tpu.vector_store %arg12[%c0_12, %c0_13, %c0_14], %26 {strides = array<i32>} : memref<1x128x256xf32, #tpu.memory_space<vmem>>, vector<1x128x256xf32>,
    %c0_15 = arith.constant 0 : index
    %c0_16 = arith.constant 0 : index
    %27 = vector.load %arg14[%c0_15, %c0_16] : memref<8x256xbf16, #tpu.memory_space<vmem>>, vector<8x256xbf16>
    %28 = arith.truncf %23 : vector<128x256xf32> to vector<128x256xbf16>
    %cst_17 = arith.constant dense<0.000000e+00> : vector<8x128xf32>
    %29 = tpu.matmul %27, %28, %cst_17 {dimension_numbers = #tpu.dot_dimension_numbers<[1], [1], [0], [0], [0, 0, 1, 0], [], []>} : vector<8x256xbf16>, vector<128x256xbf16>, vector<8x128xf32> -> vector<8x128xf32>
    %c0_18 = arith.constant 0 : index
    %30 = memref.load %arg10[%c0_18] : memref<1xf32, #tpu.memory_space<smem>>
    %31 = vector.broadcast %30 : f32 to vector<8x128xf32>
    %32 = arith.mulf %31, %29 : vector<8x128xf32>
    %33 = arith.addf %32, %4 : vector<8x128xf32>
    %c0_19 = arith.constant 0 : index
    %c0_20 = arith.constant 0 : index
    %c0_21 = arith.constant 0 : index
    %34 = vector.load %arg11[%c0_19, %c0_20, %c0_21] : memref<1x8x128xf32, #tpu.memory_space<vmem>>, vector<1x8x128xf32>
    %35 = vector.shape_cast %34 : vector<1x8x128xf32> to vector<8x128xf32>
    %36 = vector.shape_cast %33 : vector<8x128xf32> to vector<1x8x128xf32>
    tpu.vector_store %arg11[%c0_19, %c0_20, %c0_21], %36 {strides = array<i32>} : memref<1x8x128xf32, #tpu.memory_space<vmem>>, vector<1x8x128xf32>,
    return
  }
  func.func @transform_0(%arg0: i32, %arg1: i32) -> (i32, i32, i32) {
    %c0_i32 = arith.constant 0 : i32
    %c0_i32_0 = arith.constant 0 : i32
    %c0_i32_1 = arith.constant 0 : i32
    return %arg0, %c0_i32, %c0_i32_0 : i32, i32, i32
  }
  func.func @transform_1(%arg0: i32, %arg1: i32) -> (i32, i32, i32) {
    %c0_i32 = arith.constant 0 : i32
    %c0_i32_0 = arith.constant 0 : i32
    return %arg0, %c0_i32, %arg1 : i32, i32, i32
  }
  func.func @transform_2(%arg0: i32, %arg1: i32) -> (i32, i32) {
    %c0_i32 = arith.constant 0 : i32
    %c0_i32_0 = arith.constant 0 : i32
    %c0_i32_1 = arith.constant 0 : i32
    return %c0_i32, %c0_i32_0 : i32, i32
  }
  func.func @transform_3(%arg0: i32, %arg1: i32) -> (i32, i32) {
    %c0_i32 = arith.constant 0 : i32
    %c0_i32_0 = arith.constant 0 : i32
    %c0_i32_1 = arith.constant 0 : i32
    return %c0_i32, %c0_i32_0 : i32, i32
  }
  func.func @transform_4(%arg0: i32, %arg1: i32) -> (i32, i32) {
    %c0_i32 = arith.constant 0 : i32
    %c0_i32_0 = arith.constant 0 : i32
    %c0_i32_1 = arith.constant 0 : i32
    return %c0_i32, %c0_i32_0 : i32, i32
  }
  func.func @transform_5(%arg0: i32, %arg1: i32) -> (i32, i32) {
    %c0_i32 = arith.constant 0 : i32
    %c0_i32_0 = arith.constant 0 : i32
    %c0_i32_1 = arith.constant 0 : i32
    return %c0_i32, %c0_i32_0 : i32, i32
  }
  func.func @transform_6(%arg0: i32, %arg1: i32) -> (i32, i32) {
    %c0_i32 = arith.constant 0 : i32
    %c0_i32_0 = arith.constant 0 : i32
    %c0_i32_1 = arith.constant 0 : i32
    return %c0_i32, %c0_i32_0 : i32, i32
  }
  func.func @transform_7(%arg0: i32, %arg1: i32) -> (i32, i32) {
    %c0_i32 = arith.constant 0 : i32
    %c0_i32_0 = arith.constant 0 : i32
    %c0_i32_1 = arith.constant 0 : i32
    return %c0_i32, %c0_i32_0 : i32, i32
  }
  func.func @transform_8(%arg0: i32, %arg1: i32) -> i32 {
    %c0_i32 = arith.constant 0 : i32
    %c0_i32_0 = arith.constant 0 : i32
    return %c0_i32 : i32
  }
  func.func @transform_9(%arg0: i32, %arg1: i32) -> (i32, i32, i32) {
    %c0_i32 = arith.constant 0 : i32
    %c0_i32_0 = arith.constant 0 : i32
    return %arg0, %c0_i32, %arg1 : i32, i32, i32
  }
  func.func @transform_10(%arg0: i32, %arg1: i32) -> (i32, i32, i32) {
    %c0_i32 = arith.constant 0 : i32
    %c0_i32_0 = arith.constant 0 : i32
    return %arg0, %arg1, %c0_i32 : i32, i32, i32
  }
}

</mosaic_0001>

<bundles_post_ra>
// kernel: tpu_custom_call.1
= control target key start
LH: loop header
LB: loop body
LE: loop exit
PB: predicated region body
PF: predicated region fallthrough
CT: control target
= control target key end

     0   :  { %s2478_s0 = inlined_call_operand.hbm [shape: f32[2,8,256], index: 0, kind: input, shape index: {}]   ;;  %s2479_s1 = inlined_call_operand.hbm [shape: f32[2,8,256], index: 1, kind: input, shape index: {}]   ;;  %s2480_s2 = inlined_call_operand.vmem [shape: bf16[4,8], index: 2, kind: input, shape index: {}]   ;;  %s2481_s3 = inlined_call_operand.vmem [shape: f32[4,1], index: 3, kind: input, shape index: {}]   ;;  %s2482_s4 = inlined_call_operand.vmem [shape: bf16[4,8], index: 4, kind: input, shape index: {}]   ;;  %s2483_s5 = inlined_call_operand.vmem [shape: f32[4,1], index: 5, kind: input, shape index: {}]   ;;  %s2484_s6 = inlined_call_operand.vmem [shape: bf16[8,8], index: 6, kind: input, shape index: {}]   ;;  %s2485_s7 = inlined_call_operand.vmem [shape: f32[8,1], index: 7, kind: input, shape index: {}]   ;;  %s2486_s8 = inlined_call_operand.<no memory space> [shape: f32[1], index: 8, kind: input, shape index: {}]   ;;  %s2487_s9 = inlined_call_operand.hbm [shape: f32[2,8,256], index: 9, kind: output, shape index: {0}]   ;;  %s2488_s10 = inlined_call_operand.hbm [shape: f32[2,256,256], index: 10, kind: output, shape index: {1}]  }
   0x1   :  { %2501 = sst [smem:[#allocation23_spill]] %s2478_s0 }
   0x2   :  { %2502 = sst [smem:[#allocation24_spill]] %s2480_s2 }
   0x3   :  { %2503 = sst [smem:[#allocation25_spill]] %s2481_s3 }
   0x4   :  { %2504 = sst [smem:[#allocation26_spill]] %s2482_s4 }
   0x5   :  { %2505 = sst [smem:[#allocation27_spill]] %s2484_s6 }
   0x6   :  { %2506 = sst [smem:[#allocation28_spill]] %s2485_s7 }
   0x7   :  { %2507 = sst [smem:[#allocation29_spill]] %s2487_s9 }
   0x8   :  { %2508 = sst [smem:[#allocation30_spill]] %s2488_s10 }
   0x9   :  { %16 = sst [smem:[#allocation4]] %s2486_s8 }
   0xa   :  { %17 = vsyncpa [#allocation6], 0 }
   0xb   :  { %19 = vsyncpa [#allocation6 + $0x1], 0 }
   0xc   :  { %20 = vsyncpa [#allocation9], 0 }
   0xd   :  { %22 = vsyncpa [#allocation9 + $0x1], 0 }
   0xe   :  { %23 = vsyncpa [#allocation7], 0 }
   0xf   :  { %25 = vsyncpa [#allocation7 + $0x1], 0 }
  0x10   :  { %26 = vsyncpa [#allocation12], 0 }
  0x11   :  { %28 = vsyncpa [#allocation12 + $0x1], 0  ;;  %s1896_s15 = smov 0   ;;  %s1898_s16 = smov 0  }
  0x12   :  { %s1900_s17 = smov 0   ;;  %s1902_s18 = smov 0  }
  0x13   :  { %s1904_s19 = smov 0   ;;  %s1906_s20 = smov 0  }
  0x14   :  { %s1908_s8 = smov 0   ;;  %s1910_s21 = smov 0  }
  0x15   :  { %s1912_s22 = smov 0   ;;  %s1914_s23 = smov 0  }
  0x16   :  { %s1916_s24 = smov 0  }
  0x17 LB: > { %2509 = sst [smem:[#allocation17_spill]] %s1786_s15  ;;  %s2489_s25 = sadd.s32 4294967295, %s1826_s24   ;;  %s1826_s24 = sphi %s1916_s24, %s34_s24   ;;  %s1822_s23 = sphi %s1914_s23, %s2552_s23   ;;  %s1818_s22 = sphi %s1912_s22, %s2551_s22   ;;  %s1814_s21 = sphi %s1910_s21, %s2550_s21   ;;  %s1810_s8 = sphi %s1908_s8, %s2549_s8   ;;  %s1806_s20 = sphi %s1906_s20, %s2548_s20   ;;  %s1802_s19 = sphi %s1904_s19, %s2547_s19   ;;  %s1798_s18 = sphi %s1902_s18, %s2546_s18   ;;  %s1794_s17 = sphi %s1900_s17, %s2545_s17   ;;  %s1790_s16 = sphi %s1898_s16, %s2544_s16   ;;  %s1786_s15 = sphi %s1896_s15, %s2543_s15  }
  0x18   : > { %2510 = sst [smem:[#allocation18_spill]] %s1814_s21  ;;  %p60_p0 = scmp.ne.s32.totalorder %s1806_s20, %s1802_s19 }
  0x19   : > { %p61_p1 = scmp.eq.s32.totalorder %s1826_s24, 0  ;;  %p66_p2 = scmp.ne.s32.totalorder %s1802_s19, %s1798_s18 }
  0x1a   : > { %p1956_p3 = scmp.eq.s32.totalorder %s2489_s25, 0  ;;  %p2492_p6 = scmp.lt.s32.totalorder %s1826_s24, 4 }
  0x1b   : > { %p62_p4 = por %p61_p1, %p60_p0  ;;  %s342_s28 = sand.u32 1, %s1806_s20  }
  0x1c   : > { %p1964_p5 = por %p1956_p3, %p66_p2  ;;  %s1387_s29 = sshll.u32 %s1822_s23, 8 }
  0x1d   : > { %s1345_s30 = sshll.u32 %s342_s28, 4  ;;  %s2513_s0 = sld [smem:[#allocation23_spill]] }
  0x1e   : > { %s346_s14 = scalar_lea.vmem [#allocation5], %s1345_s30  ;;  %p1976_p7 = pnand %p2492_p6, %p62_p4 }
  0x1f   : > { %s354_s18 = sshll.u32 %s346_s14, 4  ;;  %p1351_p8 = scmp.ge.s32.totalorder %s1826_s24, 1  ;;  %s355_s18 = int_to_ptr.vmem [resolvable:$true] %s354_s18 }
  0x20   : > { %p379_p9 = scmp.lt.s32.totalorder %s1826_s24, 5  ;;  %s343_s9 = scalar_lea.sflag [#allocation6], %s342_s28 }
  0x21   : > { %p1618_p10 = pneg %p1976_p7  ;;  %s1629_s10 = scalar_lea.vmem %s355_s18, 256 }
  0x22   : > { %p1630_p11 = scmp.ne.s32.totalorder %s355_s18, %s1629_s10  ;;  %s1828_s11 = smov [#allocation5]  }
  0x23   : > { %s352_s13 = scalar_lea.hbm %s2513_s0, %s1387_s29  ;;  %s1634_s29 = sshll.u32 %s1828_s11, 4  ;;  %s1635_s29 = int_to_ptr.vmem [resolvable:$false] %s1634_s29 }
  0x24   : > { %p1632_p12 = pnand %p1630_p11, %p1618_p10  ;;  %s1636_s30 = scalar_lea.vmem %s1635_s29, 512 }
  0x25   : > { %p1637_p0 = scmp.lt.s32.totalorder %s355_s18, %s1635_s29  ;;  %p1638_p2 = scmp.lt.s32.totalorder %s1636_s30, %s1629_s10 }
  0x26   : > { %p1633_p13 = pneg %p1632_p12 }
  0x27   : > { %p1639_p4 = por %p1638_p2, %p1637_p0 }
  0x29   : > { %p1640_p6 = pnand %p1639_p4, %p1633_p13 }
  0x2b   : > { %1643 = shalt.err (!%p1640_p6)
}
  0x2c   : > { %1409 = dma.hbm_to_vmem [thread:$0]  (!%p1976_p7), %s352_s13, 256, %s355_s18, %s343_s9  }
  0x2d   : > { %p1990_p6 = pnand %p1351_p8, %p379_p9  ;;  %s53_s25 = sadd.s32 1, %s1806_s20 }
  0x2e   : > { %s1342_s28 = sadd.s32 4294967294, %s1826_s24   ;;  %s43_s12 = sadd.s32 1, %s1818_s22 }
  0x2f   : > { %p44_p10 = scmp.ge.s32.totalorder %s43_s12, 2  ;;  %s46_s14 = sadd.s32 1, %s1822_s23 }
  0x30   : > { %s81_s11 = sadd.s32 1, %s1794_s17  ;;  %p94_p11 = scmp.ne.s32.totalorder %s1790_s16, %s1786_s15 }
  0x31   : > { %s2554_s12 = smov (%p44_p10, %s43_s12), 0  ;;  %s2556_s14 = smov (!%p44_p10, %s46_s14), %s1822_s23 }
  0x32   : > { %2516 = sst [smem:[#allocation19_spill]] %s2554_s12  ;;  %s77_s9 = ssub.s32 %s1818_s22, %s2554_s12 }
  0x33   : > { %p88_p7 = scmp.ne.s32.totalorder %s1794_s17, %s1790_s16  ;;  %p48_p8 = scmp.ge.s32.totalorder %s2556_s14, 2 }
  0x34   : > { %p2010_p9 = por %p94_p11, %p1956_p3  ;;  %s2518_s18 = sadd.s32 4294967295, %s1826_s24  }
  0x35   : > { %p267_p12 = scmp.eq.s32.totalorder %s2518_s18, 3  ;;  %p273_p13 = scmp.eq.s32.totalorder %s1342_s28, 3 }
  0x36   : > { %s2558_s14 = smov (%p48_p8, %s2556_s14), 0  ;;  %p2030_p3 = por %p88_p7, %p61_p1 }
  0x37   : > { %2519 = sst [smem:[#allocation20_spill]] %s2558_s14  ;;  %p2018_p0 = por %p267_p12, %p88_p7 }
  0x38   : > { %p2022_p2 = por %p273_p13, %p94_p11  ;;  %s50_s26 = ssub.s32 %s1822_s23, %s2558_s14 }
  0x39   : > { %s2520_s29 = scalar_select %p2018_p0, 1, 0 }
  0x3a   : > { %s2522_s30 = scalar_select %p2022_p2, 1, 0 }
  0x3b   : > { %2521 = sst [smem:[#allocation21_spill]] %s2520_s29  ;;  %p51_p4 = scmp.eq.s32.totalorder %s50_s26, 0 }
  0x3c   : > { %2523 = sst [smem:[#allocation22_spill]] %s2522_s30  ;;  %s78_s28 = sor.u32 %s77_s9, %s50_s26 }
  0x3d   : > { %p79_p10 = scmp.eq.s32.totalorder %s78_s28, 0  ;;  %s361_s18 = sand.u32 1, %s1794_s17  }
  0x3e   : > { %s2036_s12 = scalar_select %p51_p4, %s1806_s20, %s53_s25  }
  0x3f   : > { %s2039_s15 = scalar_select %p79_p10, %s1794_s17, %s81_s11  }
  0x40   : > { %s1348_s29 = sshll.u32 %s361_s18, 3  ;;  %s1349_s21 = sshll.u32 %s1822_s23, 1 }
  0x41   : > { %s370_s2 = sadd.s32 %s1818_s22, %s1349_s21  ;;  %s365_s14 = scalar_lea.vmem [#allocation8], %s1348_s29 }
  0x42   : > { %s1350_s30 = sshll.u32 %s370_s2, 7  ;;  %s374_s3 = sshll.u32 %s365_s14, 4  ;;  %s375_s3 = int_to_ptr.vmem [resolvable:$true] %s374_s3 }
  0x43   : > { %s372_s4 = scalar_lea.hbm %s2479_s1, %s1350_s30  ;;  %p2525_p1 = scmp.lt.s32.totalorder %s1826_s24, 4 }
  0x44   : > { %s362_s25 = scalar_lea.sflag [#allocation9], %s361_s18  ;;  %s1657_s11 = scalar_lea.vmem %s375_s3, 128 }
  0x45   : > { %p2050_p11 = pnand %p2525_p1, %p2030_p3  ;;  %p1658_p8 = scmp.ne.s32.totalorder %s375_s3, %s1657_s11 }
  0x46   : > { %s1829_s2 = smov [#allocation8]  }
  0x47   : > { %p1646_p7 = pneg %p2050_p11  ;;  %s1662_s21 = sshll.u32 %s1829_s2, 4  ;;  %s1663_s21 = int_to_ptr.vmem [resolvable:$false] %s1662_s21 }
  0x48   : > { %s1664_s6 = scalar_lea.vmem %s1663_s21, 256  ;;  %p1665_p4 = scmp.lt.s32.totalorder %s375_s3, %s1663_s21 }
  0x49   : > { %p1660_p12 = pnand %p1658_p8, %p1646_p7  ;;  %p1666_p10 = scmp.lt.s32.totalorder %s1664_s6, %s1657_s11 }
  0x4b   : > { %p1661_p13 = pneg %p1660_p12  ;;  %p1667_p2 = por %p1666_p10, %p1665_p4 }
  0x4d   : > { %p1668_p0 = pnand %p1667_p2, %p1661_p13 }
  0x4f   : > { %1671 = shalt.err (!%p1668_p0)
}
  0x50   : > { %1412 = dma.hbm_to_vmem [thread:$0]  (!%p2050_p11), %s372_s4, 128, %s375_s3, %s362_s25  }
  0x51   : > { %383 = sbr.rel (%p1990_p6) target bundleno = 1457 (0x5b1), region = 56  ;;  %s385_s0 = sand.u32 (!%p1990_p6), 1, %s1802_s19  }
  0x52   : > { %s1352_s7 = sshll.u32 (!%p1990_p6), %s385_s0, 4  ;;  %s386_s14 = scalar_lea.sflag (!%p1990_p6), [#allocation6], %s385_s0 }
  0x53   : > { %s389_s29 = scalar_lea.vmem (!%p1990_p6), [#allocation5], %s1352_s7 }
  0x56   : > { %1769 = dma.done.wait (%p1964_p5), %s386_s14, 256  }
  0x57   : > { %1771 = vsyncadd (%p1964_p5), %s386_s14, 4294967040  ;;  %s2066_s30 = sand.u32 1, %s1790_s16  }
  0x58   : > { %s1353_s3 = sshll.u32 %s2066_s30, 3  ;;  %s395_s4 = scalar_lea.sflag [#allocation9], %s2066_s30 }
  0x59   : > { %s2070_s10 = scalar_lea.vmem [#allocation8], %s1353_s3 }
  0x5a   : > { %1773 = dma.done.wait (%p2010_p9), %s395_s4, 128  }
  0x5b   : > { %1775 = vsyncadd (%p2010_p9), %s395_s4, 4294967168  ;;  %s1355_s26 = sshll.u32 %s2066_s30, 8  ;;  %s2077_s28 = scalar_lea.vmem [#allocation10], %s1353_s3 }
  0x5c   : > { %s2079_s27 = scalar_lea.vmem [#allocation11], %s1355_s26  ;;  %p1356_p5 = scmp.ne.s32.totalorder %s1810_s8, 0 }
  0x5d   : > { %s2527_s11 = sld [smem:[#allocation26_spill]] (!%p1356_p5) }
  0x5e   : > { %450 = sbr.rel (%p1356_p5) target bundleno = 306 (0x132), region = 68  ;;  %s2528_s6 = sld [smem:[#allocation27_spill]] (!%p1356_p5) }
  0x5f   : > { %s2529_s14 = sld [smem:[#allocation28_spill]] (!%p1356_p5) }
  0x63   : > { %v452_v0 = vld [vmem:[%s389_s29 + $0x8] sm:$0xff]  ;;  %vm466_vm0 = vcmask 1043456   ;;  %v451_v1 = vld [vmem:[%s389_s29] sm:$0xff]  ;;  %v1830_v4 = vmov 0   ;;  %vm462_vm1 = vcmask 64512  }
  0x64   : > { %v454_v2 = vpack.c.bf16 %v452_v0, %v452_v0  ;;  %v453_v3 = vpack.c.bf16 %v451_v1, %v451_v1  ;;  %505 = vmatprep.mubr.bf16.mxu0 %v1830_v4  ;;  %556 = vmatprep.mubr.bf16.mxu1 %v1830_v4  ;;  %v456_v5 = vld [vmem:[%s2483_s5] sm:$0xf] }
  0x65   : > { %1516 = vset.pattern.permute.xlu0 %v1830_v4  ;;  %v455_v7 = vld [vmem:[%s2527_s11] sm:$0x3] }
  0x66   : > { %1357 = vmatprep.subr.msk.bf16.mxu0 %vm466_vm0, %v454_v2  ;;  %1359 = vmatprep.subr.msk.bf16.mxu1 %vm466_vm0, %v454_v2  ;;  %v468_v6 = vsel %vm466_vm0, %v453_v3, 0  ;;  %v514_v8 = vld [vmem:[%s2528_s6] sm:$0xf] }
  0x67   : > { %488 = vmatpush1.bf16.msra.mxu0 %v468_v6  ;;  %539 = vmatpush1.bf16.msra.mxu1 %v468_v6  ;;  %v515_v9 = vld [vmem:[%s2529_s14] sm:$0xff] }
  0x68   : > { %459 = vperm.xlu0 %1516, %v456_v5  }
  0x6a   : > { %1358 = vmatmul.mubr.msk.bf16.vlgmr.msra.gmra.mxu0 %vm462_vm1, %v455_v7  ;;  %1360 = vmatmul.mubr.msk.bf16.vlgmr.msra.gmra.mxu1 %vm462_vm1, %v514_v8 }
  0x6c   : > { %518 = vperm.xlu0 %1516, %v515_v9  }
  0xe3   : > { %v460_v10 = vpop.permute.xlu0 %459 }
  0xe7   : > { %v519_v13 = vpop.permute.xlu0 %518 }
 0x12a   : > { %v507_v11 = vpop.f32.mrf.mxu0  ;;  %v558_v12 = vpop.f32.mrf.mxu1 }
 0x12b   : > { %v508_v16 = vadd.f32 %v507_v11, %v460_v10  ;;  %v559_v17 = vadd.f32 %v558_v12, %v519_v13 }
 0x12c   : > { %v509_v14 = vpop.f32.mrf.mxu0  ;;  %v560_v15 = vpop.f32.mrf.mxu1 }
 0x12d   : > { %v510_v18 = vadd.f32 %v509_v14, %v460_v10  ;;  %v561_v19 = vadd.f32 %v560_v15, %v519_v13 }
 0x12e   : > { %v511_v20 = vpop.f32.mrf.mxu0  ;;  %v562_v21 = vpop.f32.mrf.mxu1 }
 0x12f   : > { %v1361_v22 = vpack.c.bf16 %v510_v18, %v508_v16  ;;  %v1388_v23 = vpack.c.bf16 %v561_v19, %v559_v17 }
 0x130   : > { %v512_v24 = vpop.f32.mrf.mxu0  ;;  %v563_v25 = vpop.f32.mrf.mxu1 }
 0x131   : > { %1362 = vst.sshfl [vmem:[#allocation2] sm:$0x33 pattern:$0x76325410] %v1361_v22  ;;  %587 = vst [vmem:[#allocation3] sm:$0xff] %v1388_v23 }
 0x132 PF: > { %v2095_v26 = vld [vmem:[%s2070_s10] sm:$0xff]  ;;  %vm601_vm2 = vcmask 1043456   ;;  %v1831_v27 = vmov 0.0   ;;  %vm1832_vm3 = vmmov 0   ;;  %s2530_s4 = sld [smem:[#allocation25_spill]]  ;;  %v1833_v30 = vmov 0  }
 0x133   : > { %1392 = vmatprep.subr.bf16.mxu0 %v1831_v27  ;;  %v590_v28 = vpack.c.bf16 %v2095_v26, %v2095_v26  ;;  %1394 = vmatprep.mubr.msk.bf16.mxu0 %vm1832_vm3, %v1831_v27  ;;  %s2531_s13 = sld [smem:[#allocation24_spill]]  ;;  %vm597_vm4 = vcmask 64512   ;;  %vm697_vm5 = vcmask 1041408   ;;  %vm672_vm6 = vcmask 31744   ;;  %s1389_s25 = sshll.u32 %s1810_s8, 5 }
 0x134   : > { %1517 = vset.pattern.permute.xlu0 %v1833_v30  ;;  %736 = vmatprep.mubr.bf16.mxu1 %v1833_v30  ;;  %s2532_s18 = sld [smem:[#allocation18_spill]]  ;;  %s1195_s21 = sshll.u32 %s2079_s27, 4  ;;  %s2378_s21 = int_to_ptr.vmem [resolvable:$true] %s1195_s21 }
 0x135   : > { %v603_v31 = vsel %vm601_vm2, %v590_v28, 0  ;;  %s2533_s9 = sld [smem:[#allocation21_spill]]  ;;  %s1164_s3 = scalar_lea.sflag [#allocation12], %s2066_s30 }
 0x136   : > { %1393 = vmatpush3.bf16.msra.mxu0 %v603_v31  ;;  %s2534_s14 = sld [smem:[#allocation30_spill]]  ;;  %s1834_s10 = smov [#allocation11]  }
 0x137   : > { %s1676_s26 = sshll.u32 %s1834_s10, 4  ;;  %s1677_s26 = int_to_ptr.vmem [resolvable:$false] %s1676_s26 }
 0x138   : > { %v591_v29 = vld [vmem:[%s2530_s4] sm:$0xf]  ;;  %s1672_s4 = scalar_lea.vmem %s2378_s21, 4096  ;;  %p1679_p3 = scmp.lt.s32.totalorder %s2378_s21, %s1677_s26 }
 0x139   : > { %594 = vperm.xlu0 %1517, %v591_v29   ;;  %v589_v32 = vld [vmem:[%s2531_s13] sm:$0x3]  ;;  %p1673_p6 = scmp.ne.s32.totalorder %s2378_s21, %s1672_s4 }
 0x13a   : > { %1395 = vmatmul.mubr.msk.bf16.vlgmr.msra.gmra.mxu0 %vm597_vm4, %v589_v32  ;;  %v1365_v33 = vld.sshfl [vmem:[#allocation2] sm:$0x33 pattern:$0x76325410]  ;;  %s1383_s11 = sshll.u32 %s2532_s18, 6 }
 0x13b   : > { %v671_v34 = vcombine.high %v1365_v33, %v1365_v33  ;;  %v699_v35 = vsel %vm697_vm5, %v1365_v33, 0  ;;  %s1192_s2 = sadd.s32 %s1389_s25, %s1383_s11  ;;  %p2535_p9 = scmp.ne.s32.totalorder %s2533_s9, 0 }
 0x13c   : > { %s1384_s6 = sshll.u32 %s1192_s2, 7 }
 0x13d   : > { %1366 = vmatprep.subr.msk.bf16.mxu1 %vm697_vm5, %v671_v34  ;;  %s2383_s29 = scalar_lea.hbm %s2534_s14, %s1384_s6  ;;  %p1674_p0 = pnand %p1673_p6, %p2535_p9 }
 0x13e   : > { %719 = vmatpush1.bf16.msra.mxu1 %v699_v35 }
 0x13f   : > { %p1675_p2 = pneg %p1674_p0 }
 0x1b4   : > { %v595_v36 = vpop.permute.xlu0 %594 }
 0x1fa   : > { %v639_v37 = vpop.f32.mrf.mxu0 }
 0x1fb   : > { %v640_v38 = vadd.f32 %v639_v37, %v595_v36 }
 0x1fc   : > { %v1396_v39 = vpop.f32.mrf.mxu0 }
 0x1fd   : > { %v645_v40 = vpack.c.bf16 %v640_v38, %v640_v38 }
 0x1fe   : > { %v642_v41 = vpop.f32.mrf.mxu0 }
 0x1ff   : > { %647 = vxpose.xlu0.c.b16.start.end [1/1] (short) %v645_v40, 128 }
 0x200   : > { %v1397_v42 = vpop.f32.mrf.mxu0 }
 0x261   : > { %v655_v43 = vpop.trf.xlu0 }
 0x262   : > { %1367 = vmatmul.mubr.msk.bf16.vlgmr.msra.gmra.mxu1 %vm672_vm6, %v655_v43 }
 0x263   : > { %746 = vmatprep.mubr.bf16.mxu1 %v1833_v30 }
 0x265   : > { %v656_v44 = vpop.trf.xlu0 }
 0x269   : > { %v657_v45 = vpop.trf.xlu0 }
 0x26a   : > { %1368 = vmatmul.mubr.msk.bf16.gmra.mxu1 %vm672_vm6, %v656_v44 }
 0x26b   : > { %756 = vmatprep.mubr.bf16.mxu1 %v1833_v30 }
 0x26d   : > { %v658_v46 = vpop.trf.xlu0 }
 0x271   : > { %v659_v47 = vpop.trf.xlu0 }
 0x272   : > { %1369 = vmatmul.mubr.msk.bf16.gmra.mxu1 %vm672_vm6, %v657_v45 }
 0x273   : > { %766 = vmatprep.mubr.bf16.mxu1 %v1833_v30 }
 0x275   : > { %v660_v48 = vpop.trf.xlu0 }
 0x279   : > { %v661_v49 = vpop.trf.xlu0 }
 0x27a   : > { %1370 = vmatmul.mubr.msk.bf16.gmra.mxu1 %vm672_vm6, %v658_v46 }
 0x27b   : > { %776 = vmatprep.mubr.bf16.mxu1 %v1833_v30 }
 0x27d   : > { %v662_v50 = vpop.trf.xlu0 }
 0x282   : > { %1371 = vmatmul.mubr.msk.bf16.gmra.mxu1 %vm672_vm6, %v659_v47 }
 0x283   : > { %786 = vmatprep.mubr.bf16.mxu1 %v1833_v30 }
 0x28a   : > { %1372 = vmatmul.mubr.msk.bf16.gmra.mxu1 %vm672_vm6, %v660_v48 }
 0x28b   : > { %796 = vmatprep.mubr.bf16.mxu1 %v1833_v30 }
 0x292   : > { %1373 = vmatmul.mubr.msk.bf16.gmra.mxu1 %vm672_vm6, %v661_v49 }
 0x293   : > { %806 = vmatprep.mubr.bf16.mxu1 %v1833_v30 }
 0x29a   : > { %1374 = vmatmul.mubr.msk.bf16.gmra.mxu1 %vm672_vm6, %v662_v50 }
 0x322   : > { %v2113_v51 = vpop.f32.mrf.mxu1 }
 0x324   : > { %v2115_v52 = vpop.f32.mrf.mxu1 }
 0x325   : > { %v817_v34 = vmax.f32 %v2113_v51, %v2115_v52 }
 0x326   : > { %v2117_v53 = vpop.f32.mrf.mxu1 }
 0x328   : > { %v2119_v54 = vpop.f32.mrf.mxu1 }
 0x329   : > { %v820_v35 = vmax.f32 %v2117_v53, %v2119_v54 }
 0x32a   : > { %v2121_v55 = vpop.f32.mrf.mxu1 }
 0x32c   : > { %v2123_v56 = vpop.f32.mrf.mxu1 }
 0x32d   : > { %v823_v32 = vmax.f32 %v2121_v55, %v2123_v56 }
 0x32e   : > { %v2125_v57 = vpop.f32.mrf.mxu1 }
 0x330   : > { %v2127_v58 = vpop.f32.mrf.mxu1 }
 0x331   : > { %v826_v33 = vmax.f32 %v2125_v57, %v2127_v58 }
 0x332   : > { %v2129_v59 = vpop.f32.mrf.mxu1 }
 0x334   : > { %v2131_v60 = vpop.f32.mrf.mxu1 }
 0x335   : > { %v829_v30 = vmax.f32 %v2129_v59, %v2131_v60 }
 0x336   : > { %v2133_v61 = vpop.f32.mrf.mxu1 }
 0x338   : > { %v2135_v62 = vpop.f32.mrf.mxu1 }
 0x339   : > { %v832_v31 = vmax.f32 %v2133_v61, %v2135_v62 }
 0x33a   : > { %v2137_v63 = vpop.f32.mrf.mxu1 }
 0x33c   : > { %v2139_v0 = vpop.f32.mrf.mxu1 }
 0x33d   : > { %v835_v29 = vmax.f32 %v2137_v63, %v2139_v0 }
 0x33e   : > { %v2141_v1 = vpop.f32.mrf.mxu1 }
 0x340   : > { %v2143_v2 = vpop.f32.mrf.mxu1 }
 0x341   : > { %v838_v3 = vmax.f32 %v2141_v1, %v2143_v2 }
 0x342   : > { %v2147_v4 = vpop.f32.mrf.mxu1 }
 0x343   : > { %839 = vmax.xlane.f32.xlu0 %v838_v3 }
 0x344   : > { %v2149_v5 = vpop.f32.mrf.mxu1 }
 0x345   : > { %v841_v27 = vmax.f32 %v2147_v4, %v2149_v5 }
 0x346   : > { %v2151_v6 = vpop.f32.mrf.mxu1 }
 0x348   : > { %v2153_v7 = vpop.f32.mrf.mxu1 }
 0x349   : > { %v844_v28 = vmax.f32 %v2151_v6, %v2153_v7 }
 0x34a   : > { %v2155_v8 = vpop.f32.mrf.mxu1 }
 0x34c   : > { %v2157_v9 = vpop.f32.mrf.mxu1 }
 0x34d   : > { %v847_v24 = vmax.f32 %v2155_v8, %v2157_v9 }
 0x34e   : > { %v2159_v10 = vpop.f32.mrf.mxu1 }
 0x350   : > { %v2161_v11 = vpop.f32.mrf.mxu1 }
 0x351   : > { %v850_v25 = vmax.f32 %v2159_v10, %v2161_v11 }
 0x352   : > { %v798_v12 = vpop.f32.mrf.mxu1 }
 0x354   : > { %v800_v13 = vpop.f32.mrf.mxu1 }
 0x355   : > { %v853_v22 = vmax.f32 %v798_v12, %v800_v13 }
 0x356   : > { %v802_v14 = vpop.f32.mrf.mxu1 }
 0x358   : > { %v804_v15 = vpop.f32.mrf.mxu1 }
 0x359   : > { %v856_v23 = vmax.f32 %v802_v14, %v804_v15 }
 0x35a   : > { %v808_v16 = vpop.f32.mrf.mxu1 }
 0x35c   : > { %v810_v17 = vpop.f32.mrf.mxu1 }
 0x35d   : > { %v859_v18 = vmax.f32 %v808_v16, %v810_v17 }
 0x35e   : > { %v812_v19 = vpop.f32.mrf.mxu1 }
 0x35f   : > { %860 = vmax.xlane.f32.xlu1 %v859_v18 }
 0x360   : > { %v814_v20 = vpop.f32.mrf.mxu1 }
 0x361   : > { %v862_v21 = vmax.f32 %v812_v19, %v814_v20 }
 0x363   : > { %863 = vmax.xlane.f32.xlu1 %v862_v21 }
 0x367   : > { %854 = vmax.xlane.f32.xlu1 %v853_v22 }
 0x36b   : > { %857 = vmax.xlane.f32.xlu1 %v856_v23 }
 0x36f   : > { %848 = vmax.xlane.f32.xlu1 %v847_v24 }
 0x373   : > { %851 = vmax.xlane.f32.xlu1 %v850_v25 }
 0x377   : > { %842 = vmax.xlane.f32.xlu1 %v841_v27 }
 0x37b   : > { %845 = vmax.xlane.f32.xlu1 %v844_v28 }
 0x37f   : > { %836 = vmax.xlane.f32.xlu1 %v835_v29 }
 0x383   : > { %830 = vmax.xlane.f32.xlu1 %v829_v30 }
 0x387   : > { %833 = vmax.xlane.f32.xlu1 %v832_v31 }
 0x38b   : > { %824 = vmax.xlane.f32.xlu1 %v823_v32 }
 0x38f   : > { %827 = vmax.xlane.f32.xlu1 %v826_v33 }
 0x393   : > { %818 = vmax.xlane.f32.xlu1 %v817_v34 }
 0x397   : > { %821 = vmax.xlane.f32.xlu1 %v820_v35 }
 0x3cc   : > { %v840_v30 = vpop.xlane.xlu0 %839 }
 0x3cd   : > { %v879_v35 = vsub.f32 %v2141_v1, %v840_v30 }
 0x3cf   : > { %v925_v1 = vmul.f32 1.442695, %v879_v35 }
 0x3e8   : > { %v861_v36 = vpop.xlane.xlu1 %860 }
 0x3e9   : > { %v893_v37 = vsub.f32 %v808_v16, %v861_v36  ;;  %v894_v38 = vsub.f32 %v810_v17, %v861_v36 }
 0x3eb   : > { %v953_v39 = vmul.f32 1.442695, %v893_v37  ;;  %v955_v40 = vmul.f32 1.442695, %v894_v38  ;;  %v880_v38 = vsub.f32 %v2143_v2, %v840_v30 }
 0x3ec   : > { %v864_v41 = vpop.xlane.xlu1 %863 }
 0x3ed   : > { %1520 = vpow2.f32 %v953_v39  ;;  %v895_v42 = vsub.f32 %v812_v19, %v864_v41  ;;  %v896_v43 = vsub.f32 %v814_v20, %v864_v41 }
 0x3ee   : > { %1522 = vpow2.f32 %v955_v40 }
 0x3ef   : > { %v957_v44 = vmul.f32 1.442695, %v895_v42  ;;  %v959_v45 = vmul.f32 1.442695, %v896_v43 }
 0x3f0   : > { %v855_v46 = vpop.xlane.xlu1 %854 }
 0x3f1   : > { %1524 = vpow2.f32 %v957_v44  ;;  %v889_v47 = vsub.f32 %v798_v12, %v855_v46  ;;  %v890_v48 = vsub.f32 %v800_v13, %v855_v46 }
 0x3f2   : > { %1526 = vpow2.f32 %v959_v45  ;;  %v927_v45 = vmul.f32 1.442695, %v880_v38 }
 0x3f3   : > { %v945_v49 = vmul.f32 1.442695, %v889_v47  ;;  %v947_v50 = vmul.f32 1.442695, %v890_v48 }
 0x3f4   : > { %v858_v3 = vpop.xlane.xlu1 %857 }
 0x3f5   : > { %1528 = vpow2.f32 %v945_v49  ;;  %v891_v16 = vsub.f32 %v802_v14, %v858_v3  ;;  %v892_v17 = vsub.f32 %v804_v15, %v858_v3 }
 0x3f6   : > { %1530 = vpow2.f32 %v947_v50 }
 0x3f7   : > { %v949_v18 = vmul.f32 1.442695, %v891_v16  ;;  %v951_v21 = vmul.f32 1.442695, %v892_v17 }
 0x3f8   : > { %v849_v22 = vpop.xlane.xlu1 %848 }
 0x3f9   : > { %1532 = vpow2.f32 %v949_v18  ;;  %v885_v19 = vsub.f32 %v2155_v8, %v849_v22  ;;  %v886_v20 = vsub.f32 %v2157_v9, %v849_v22 }
 0x3fa   : > { %v2187_v23 = vpop.eup %1520  ;;  %1534 = vpow2.f32 %v951_v21 }
 0x3fb   : > { %v2189_v12 = vpop.eup %1522  ;;  %v937_v13 = vmul.f32 1.442695, %v885_v19  ;;  %v939_v24 = vmul.f32 1.442695, %v886_v20 }
 0x3fc   : > { %v852_v25 = vpop.xlane.xlu1 %851  ;;  %v1003_v14 = vadd.f32 %v2189_v12, %v2187_v23 }
 0x3fd   : > { %1536 = vpow2.f32 %v937_v13  ;;  %v887_v15 = vsub.f32 %v2159_v10, %v852_v25  ;;  %v888_v27 = vsub.f32 %v2161_v11, %v852_v25 }
 0x3fe   : > { %v2195_v28 = vpop.eup %1524  ;;  %1538 = vpow2.f32 %v939_v24  ;;  %1004 = vadd.xlane.f32.xlu1 %v1003_v14 }
 0x3ff   : > { %v2197_v8 = vpop.eup %1526  ;;  %v941_v9 = vmul.f32 1.442695, %v887_v15  ;;  %v943_v29 = vmul.f32 1.442695, %v888_v27 }
 0x400   : > { %v843_v31 = vpop.xlane.xlu1 %842  ;;  %v1006_v32 = vadd.f32 %v2197_v8, %v2195_v28 }
 0x401   : > { %1540 = vpow2.f32 %v941_v9  ;;  %v881_v33 = vsub.f32 %v2147_v4, %v843_v31  ;;  %v882_v10 = vsub.f32 %v2149_v5, %v843_v31 }
 0x402   : > { %v2203_v34 = vpop.eup %1528  ;;  %1542 = vpow2.f32 %v943_v29  ;;  %1007 = vadd.xlane.f32.xlu1 %v1006_v32 }
 0x403   : > { %v2205_v11 = vpop.eup %1530  ;;  %v929_v36 = vmul.f32 1.442695, %v881_v33  ;;  %v931_v37 = vmul.f32 1.442695, %v882_v10 }
 0x404   : > { %v846_v39 = vpop.xlane.xlu1 %845  ;;  %v997_v40 = vadd.f32 %v2205_v11, %v2203_v34 }
 0x405   : > { %1544 = vpow2.f32 %v929_v36  ;;  %v883_v4 = vsub.f32 %v2151_v6, %v846_v39  ;;  %v884_v5 = vsub.f32 %v2153_v7, %v846_v39 }
 0x406   : > { %v2213_v41 = vpop.eup %1532  ;;  %1546 = vpow2.f32 %v931_v37  ;;  %998 = vadd.xlane.f32.xlu1 %v997_v40 }
 0x407   : > { %v2215_v42 = vpop.eup %1534  ;;  %v933_v43 = vmul.f32 1.442695, %v883_v4  ;;  %v935_v44 = vmul.f32 1.442695, %v884_v5 }
 0x408   : > { %v837_v2 = vpop.xlane.xlu1 %836  ;;  %v1000_v46 = vadd.f32 %v2215_v42, %v2213_v41 }
 0x409   : > { %1548 = vpow2.f32 %v933_v43  ;;  %v877_v47 = vsub.f32 %v2137_v63, %v837_v2  ;;  %v878_v6 = vsub.f32 %v2139_v0, %v837_v2 }
 0x40a   : > { %v2221_v7 = vpop.eup %1536  ;;  %1550 = vpow2.f32 %v935_v44  ;;  %1001 = vadd.xlane.f32.xlu1 %v1000_v46 }
 0x40b   : > { %v2223_v48 = vpop.eup %1538  ;;  %1552 = vpow2.f32 %v925_v1  ;;  %v921_v49 = vmul.f32 1.442695, %v877_v47  ;;  %v923_v50 = vmul.f32 1.442695, %v878_v6 }
 0x40c   : > { %1554 = vpow2.f32 %v927_v45  ;;  %v831_v3 = vpop.xlane.xlu1 %830  ;;  %v991_v16 = vadd.f32 %v2223_v48, %v2221_v7 }
 0x40d   : > { %1556 = vpow2.f32 %v921_v49  ;;  %v873_v17 = vsub.f32 %v2129_v59, %v831_v3  ;;  %v874_v63 = vsub.f32 %v2131_v60, %v831_v3 }
 0x40e   : > { %v2229_v0 = vpop.eup %1540  ;;  %1558 = vpow2.f32 %v923_v50  ;;  %992 = vadd.xlane.f32.xlu0 %v991_v16 }
 0x40f   : > { %v2231_v18 = vpop.eup %1542  ;;  %v913_v21 = vmul.f32 1.442695, %v873_v17  ;;  %v915_v22 = vmul.f32 1.442695, %v874_v63 }
 0x410   : > { %v834_v19 = vpop.xlane.xlu1 %833  ;;  %v994_v20 = vadd.f32 %v2231_v18, %v2229_v0 }
 0x411   : > { %1560 = vpow2.f32 %v913_v21  ;;  %v875_v13 = vsub.f32 %v2133_v61, %v834_v19  ;;  %v876_v24 = vsub.f32 %v2135_v62, %v834_v19 }
 0x412   : > { %v2237_v59 = vpop.eup %1544  ;;  %1562 = vpow2.f32 %v915_v22  ;;  %995 = vadd.xlane.f32.xlu1 %v994_v20 }
 0x413   : > { %v2239_v60 = vpop.eup %1546  ;;  %v917_v25 = vmul.f32 1.442695, %v875_v13  ;;  %v919_v14 = vmul.f32 1.442695, %v876_v24 }
 0x414   : > { %v825_v15 = vpop.xlane.xlu1 %824  ;;  %v985_v27 = vadd.f32 %v2239_v60, %v2237_v59 }
 0x415   : > { %1564 = vpow2.f32 %v917_v25  ;;  %v869_v9 = vsub.f32 %v2121_v55, %v825_v15  ;;  %v870_v29 = vsub.f32 %v2123_v56, %v825_v15 }
 0x416   : > { %v2245_v61 = vpop.eup %1548  ;;  %1566 = vpow2.f32 %v919_v14  ;;  %986 = vadd.xlane.f32.xlu0 %v985_v27  ;;  %v2305_v14 = vld [vmem:[#allocation3] sm:$0xff] }
 0x417   : > { %v2247_v62 = vpop.eup %1550  ;;  %v905_v30 = vmul.f32 1.442695, %v869_v9  ;;  %v907_v31 = vmul.f32 1.442695, %v870_v29  ;;  %v1376_v15 = vcombine.high %v2305_v14, %v2305_v14 }
 0x418   : > { %v2249_v32 = vpop.eup %1552  ;;  %v828_v33 = vpop.xlane.xlu1 %827  ;;  %v988_v10 = vadd.f32 %v2247_v62, %v2245_v61 }
 0x419   : > { %v2253_v35 = vpop.eup %1554  ;;  %1568 = vpow2.f32 %v905_v30  ;;  %v871_v55 = vsub.f32 %v2125_v57, %v828_v33  ;;  %v872_v56 = vsub.f32 %v2127_v58, %v828_v33  ;;  %1145 = vmatprep.mubr.bf16.mxu0 %v1376_v15 }
 0x41a   : > { %v2257_v36 = vpop.eup %1556  ;;  %1570 = vpow2.f32 %v907_v31  ;;  %989 = vadd.xlane.f32.xlu1 %v988_v10  ;;  %v982_v5 = vadd.f32 %v2253_v35, %v2249_v32 }
 0x41b   : > { %v2259_v37 = vpop.eup %1558  ;;  %v909_v38 = vmul.f32 1.442695, %v871_v55  ;;  %v911_v39 = vmul.f32 1.442695, %v872_v56 }
 0x41c   : > { %v819_v40 = vpop.xlane.xlu1 %818  ;;  %v979_v4 = vadd.f32 %v2259_v37, %v2257_v36 }
 0x41d   : > { %1572 = vpow2.f32 %v909_v38  ;;  %v865_v57 = vsub.f32 %v2113_v51, %v819_v40  ;;  %v866_v58 = vsub.f32 %v2115_v52, %v819_v40 }
 0x41e   : > { %v2267_v1 = vpop.eup %1560  ;;  %1574 = vpow2.f32 %v911_v39  ;;  %980 = vadd.xlane.f32.xlu0 %v979_v4  ;;  %983 = vadd.xlane.f32.xlu1 %v982_v5 }
 0x41f   : > { %v2269_v43 = vpop.eup %1562  ;;  %v897_v44 = vmul.f32 1.442695, %v865_v57  ;;  %v899_v45 = vmul.f32 1.442695, %v866_v58 }
 0x420   : > { %v822_v2 = vpop.xlane.xlu1 %821  ;;  %v973_v46 = vadd.f32 %v2269_v43, %v2267_v1 }
 0x421   : > { %1576 = vpow2.f32 %v897_v44  ;;  %v867_v47 = vsub.f32 %v2117_v53, %v822_v2  ;;  %v868_v51 = vsub.f32 %v2119_v54, %v822_v2 }
 0x422   : > { %v2275_v6 = vpop.eup %1564  ;;  %1578 = vpow2.f32 %v899_v45  ;;  %974 = vadd.xlane.f32.xlu0 %v973_v46 }
 0x423   : > { %v2277_v52 = vpop.eup %1566  ;;  %v901_v49 = vmul.f32 1.442695, %v867_v47  ;;  %v903_v50 = vmul.f32 1.442695, %v868_v51 }
 0x424   : > { %v976_v3 = vadd.f32 %v2277_v52, %v2275_v6 }
 0x425   : > { %1580 = vpow2.f32 %v901_v49 }
 0x426   : > { %v2281_v16 = vpop.eup %1568  ;;  %1582 = vpow2.f32 %v903_v50  ;;  %977 = vadd.xlane.f32.xlu1 %v976_v3 }
 0x427   : > { %v2283_v17 = vpop.eup %1570 }
 0x428   : > { %v967_v53 = vadd.f32 %v2283_v17, %v2281_v16 }
 0x42a   : > { %v2287_v54 = vpop.eup %1572  ;;  %968 = vadd.xlane.f32.xlu0 %v967_v53 }
 0x42b   : > { %v2289_v63 = vpop.eup %1574 }
 0x42c   : > { %v970_v21 = vadd.f32 %v2289_v63, %v2287_v54 }
 0x42e   : > { %v2293_v22 = vpop.eup %1576  ;;  %971 = vadd.xlane.f32.xlu1 %v970_v21 }
 0x42f   : > { %v2295_v19 = vpop.eup %1578 }
 0x430   : > { %v961_v20 = vadd.f32 %v2295_v19, %v2293_v22 }
 0x432   : > { %v2299_v13 = vpop.eup %1580  ;;  %962 = vadd.xlane.f32.xlu0 %v961_v20 }
 0x433   : > { %v2301_v24 = vpop.eup %1582 }
 0x434   : > { %v964_v25 = vadd.f32 %v2301_v24, %v2299_v13 }
 0x436   : > { %965 = vadd.xlane.f32.xlu1 %v964_v25 }
 0x487   : > { %v1005_v27 = vpop.xlane.xlu1 %1004 }
 0x488   : > { %1584 = vrcp.f32 %v1005_v27 }
 0x48b   : > { %v1008_v9 = vpop.xlane.xlu1 %1007 }
 0x48c   : > { %1586 = vrcp.f32 %v1008_v9 }
 0x48f   : > { %v999_v29 = vpop.xlane.xlu1 %998 }
 0x490   : > { %1588 = vrcp.f32 %v999_v29 }
 0x493   : > { %v1002_v30 = vpop.xlane.xlu1 %1001 }
 0x494   : > { %1590 = vrcp.f32 %v1002_v30 }
 0x495   : > { %v1585_v31 = vpop.eup %1584 }
 0x496   : > { %v1054_v33 = vmul.f32 %v1585_v31, %v2189_v12  ;;  %v1053_v10 = vmul.f32 %v1585_v31, %v2187_v23 }
 0x497   : > { %v993_v55 = vpop.xlane.xlu0 %992 }
 0x498   : > { %1592 = vrcp.f32 %v993_v55  ;;  %1086 = vst [vmem:[%s2079_s27 + $0xe8] sm:$0xff] %v1054_v33  ;;  %1085 = vst [vmem:[%s2079_s27 + $0xe0] sm:$0xff] %v1053_v10 }
 0x499   : > { %v1587_v56 = vpop.eup %1586 }
 0x49a   : > { %v1056_v38 = vmul.f32 %v1587_v56, %v2197_v8  ;;  %v1055_v39 = vmul.f32 %v1587_v56, %v2195_v28 }
 0x49b   : > { %v996_v40 = vpop.xlane.xlu1 %995 }
 0x49c   : > { %1594 = vrcp.f32 %v996_v40  ;;  %1088 = vst [vmem:[%s2079_s27 + $0xf8] sm:$0xff] %v1056_v38  ;;  %v1105_v4 = vpack.c.bf16 %v1056_v38, %v1054_v33  ;;  %1087 = vst [vmem:[%s2079_s27 + $0xf0] sm:$0xff] %v1055_v39  ;;  %v1104_v12 = vpack.c.bf16 %v1055_v39, %v1053_v10 }
 0x49d   : > { %v1589_v5 = vpop.eup %1588 }
 0x49e   : > { %1113 = vmatprep.subr.bf16.mxu0 %v1105_v4  ;;  %v1050_v23 = vmul.f32 %v1589_v5, %v2205_v11  ;;  %v1049_v57 = vmul.f32 %v1589_v5, %v2203_v34 }
 0x49f   : > { %1114 = vmatpush1.bf16.xpose.msra.mxu0 %v1104_v12  ;;  %v987_v58 = vpop.xlane.xlu0 %986 }
 0x4a0   : > { %1596 = vrcp.f32 %v987_v58  ;;  %1082 = vst [vmem:[%s2079_s27 + $0xc8] sm:$0xff] %v1050_v23  ;;  %1081 = vst [vmem:[%s2079_s27 + $0xc0] sm:$0xff] %v1049_v57 }
 0x4a1   : > { %v1591_v28 = vpop.eup %1590 }
 0x4a2   : > { %v1052_v8 = vmul.f32 %v1591_v28, %v2215_v42  ;;  %v1051_v44 = vmul.f32 %v1591_v28, %v2213_v41 }
 0x4a3   : > { %v990_v45 = vpop.xlane.xlu1 %989 }
 0x4a4   : > { %1598 = vrcp.f32 %v990_v45  ;;  %1084 = vst [vmem:[%s2079_s27 + $0xd8] sm:$0xff] %v1052_v8  ;;  %v1103_v2 = vpack.c.bf16 %v1052_v8, %v1050_v23  ;;  %1083 = vst [vmem:[%s2079_s27 + $0xd0] sm:$0xff] %v1051_v44  ;;  %v1102_v11 = vpack.c.bf16 %v1051_v44, %v1049_v57 }
 0x4a5   : > { %v1593_v46 = vpop.eup %1592 }
 0x4a6   : > { %1115 = vmatprep.subr.bf16.mxu0 %v1103_v2  ;;  %v1046_v34 = vmul.f32 %v1593_v46, %v2223_v48  ;;  %v1045_v47 = vmul.f32 %v1593_v46, %v2221_v7 }
 0x4a7   : > { %1116 = vmatpush1.bf16.xpose.msra.mxu0 %v1102_v11  ;;  %v984_v42 = vpop.xlane.xlu1 %983  ;;  %v981_v51 = vpop.xlane.xlu0 %980 }
 0x4a8   : > { %1600 = vrcp.f32 %v984_v42  ;;  %1078 = vst [vmem:[%s2079_s27 + $0xa8] sm:$0xff] %v1046_v34  ;;  %1077 = vst [vmem:[%s2079_s27 + $0xa0] sm:$0xff] %v1045_v47 }
 0x4a9   : > { %v1595_v41 = vpop.eup %1594  ;;  %1602 = vrcp.f32 %v981_v51 }
 0x4aa   : > { %v1048_v49 = vmul.f32 %v1595_v41, %v2231_v18  ;;  %v1047_v50 = vmul.f32 %v1595_v41, %v2229_v0 }
 0x4ab   : > { %v975_v3 = vpop.xlane.xlu0 %974 }
 0x4ac   : > { %1604 = vrcp.f32 %v975_v3  ;;  %1080 = vst [vmem:[%s2079_s27 + $0xb8] sm:$0xff] %v1048_v49  ;;  %v1101_v48 = vpack.c.bf16 %v1048_v49, %v1046_v34  ;;  %1079 = vst [vmem:[%s2079_s27 + $0xb0] sm:$0xff] %v1047_v50  ;;  %v1100_v7 = vpack.c.bf16 %v1047_v50, %v1045_v47 }
 0x4ad   : > { %v1597_v53 = vpop.eup %1596 }
 0x4ae   : > { %1117 = vmatprep.subr.bf16.mxu0 %v1101_v48  ;;  %v1042_v21 = vmul.f32 %v1597_v53, %v2239_v60  ;;  %v1041_v20 = vmul.f32 %v1597_v53, %v2237_v59 }
 0x4af   : > { %v978_v25 = vpop.xlane.xlu1 %977  ;;  %1118 = vmatpush1.bf16.xpose.msra.mxu0 %v1100_v7 }
 0x4b0   : > { %1606 = vrcp.f32 %v978_v25  ;;  %1074 = vst [vmem:[%s2079_s27 + $0x88] sm:$0xff] %v1042_v21  ;;  %1073 = vst [vmem:[%s2079_s27 + $0x80] sm:$0xff] %v1041_v20 }
 0x4b1   : > { %v1599_v0 = vpop.eup %1598 }
 0x4b2   : > { %v1044_v18 = vmul.f32 %v1599_v0, %v2247_v62  ;;  %v1043_v15 = vmul.f32 %v1599_v0, %v2245_v61 }
 0x4b3   : > { %v969_v27 = vpop.xlane.xlu0 %968 }
 0x4b4   : > { %1608 = vrcp.f32 %v969_v27  ;;  %1076 = vst [vmem:[%s2079_s27 + $0x98] sm:$0xff] %v1044_v18  ;;  %v1099_v9 = vpack.c.bf16 %v1044_v18, %v1042_v21  ;;  %1075 = vst [vmem:[%s2079_s27 + $0x90] sm:$0xff] %v1043_v15  ;;  %v1098_v60 = vpack.c.bf16 %v1043_v15, %v1041_v20 }
 0x4b5   : > { %v1601_v59 = vpop.eup %1600 }
 0x4b6   : > { %v1603_v29 = vpop.eup %1602  ;;  %1119 = vmatprep.subr.bf16.mxu0 %v1099_v9  ;;  %v1040_v30 = vmul.f32 %v1601_v59, %v2253_v35  ;;  %v1039_v31 = vmul.f32 %v1601_v59, %v2249_v32 }
 0x4b7   : > { %v972_v62 = vpop.xlane.xlu1 %971  ;;  %1120 = vmatpush1.bf16.xpose.msra.mxu0 %v1098_v60  ;;  %v1038_v61 = vmul.f32 %v1603_v29, %v2259_v37  ;;  %v1037_v33 = vmul.f32 %v1603_v29, %v2257_v36 }
 0x4b8   : > { %1610 = vrcp.f32 %v972_v62  ;;  %1072 = vst [vmem:[%s2079_s27 + $0x78] sm:$0xff] %v1040_v30  ;;  %1071 = vst [vmem:[%s2079_s27 + $0x70] sm:$0xff] %v1039_v31 }
 0x4b9   : > { %v1605_v10 = vpop.eup %1604  ;;  %1070 = vst [vmem:[%s2079_s27 + $0x68] sm:$0xff] %v1038_v61  ;;  %v1097_v55 = vpack.c.bf16 %v1040_v30, %v1038_v61  ;;  %1069 = vst [vmem:[%s2079_s27 + $0x60] sm:$0xff] %v1037_v33  ;;  %v1096_v37 = vpack.c.bf16 %v1039_v31, %v1037_v33 }
 0x4ba   : > { %v1034_v35 = vmul.f32 %v1605_v10, %v2269_v43  ;;  %v1033_v32 = vmul.f32 %v1605_v10, %v2267_v1 }
 0x4bb   : > { %1121 = vmatprep.subr.bf16.mxu0 %v1097_v55  ;;  %v963_v56 = vpop.xlane.xlu0 %962 }
 0x4bc   : > { %1612 = vrcp.f32 %v963_v56  ;;  %1066 = vst [vmem:[%s2079_s27 + $0x48] sm:$0xff] %v1034_v35  ;;  %1065 = vst [vmem:[%s2079_s27 + $0x40] sm:$0xff] %v1033_v32 }
 0x4bd   : > { %v1607_v36 = vpop.eup %1606 }
 0x4be   : > { %v1036_v38 = vmul.f32 %v1607_v36, %v2277_v52  ;;  %v1035_v39 = vmul.f32 %v1607_v36, %v2275_v6 }
 0x4bf   : > { %v966_v40 = vpop.xlane.xlu1 %965  ;;  %1122 = vmatpush1.bf16.xpose.msra.mxu0 %v1096_v37 }
 0x4c0   : > { %1614 = vrcp.f32 %v966_v40  ;;  %1068 = vst [vmem:[%s2079_s27 + $0x58] sm:$0xff] %v1036_v38  ;;  %v1095_v1 = vpack.c.bf16 %v1036_v38, %v1034_v35  ;;  %1067 = vst [vmem:[%s2079_s27 + $0x50] sm:$0xff] %v1035_v39  ;;  %v1094_v6 = vpack.c.bf16 %v1035_v39, %v1033_v32 }
 0x4c1   : > { %v1609_v43 = vpop.eup %1608 }
 0x4c2   : > { %1123 = vmatprep.subr.bf16.mxu0 %v1095_v1  ;;  %v1030_v4 = vmul.f32 %v1609_v43, %v2283_v17  ;;  %v1029_v12 = vmul.f32 %v1609_v43, %v2281_v16 }
 0x4c4   : > { %1062 = vst [vmem:[%s2079_s27 + $0x28] sm:$0xff] %v1030_v4  ;;  %1061 = vst [vmem:[%s2079_s27 + $0x20] sm:$0xff] %v1029_v12 }
 0x4c5   : > { %v1611_v52 = vpop.eup %1610 }
 0x4c6   : > { %v1032_v5 = vmul.f32 %v1611_v52, %v2289_v63  ;;  %v1031_v23 = vmul.f32 %v1611_v52, %v2287_v54 }
 0x4c7   : > { %1124 = vmatpush1.bf16.xpose.msra.mxu0 %v1094_v6 }
 0x4c8   : > { %1064 = vst [vmem:[%s2079_s27 + $0x38] sm:$0xff] %v1032_v5  ;;  %v1093_v57 = vpack.c.bf16 %v1032_v5, %v1030_v4  ;;  %1063 = vst [vmem:[%s2079_s27 + $0x30] sm:$0xff] %v1031_v23  ;;  %v1092_v63 = vpack.c.bf16 %v1031_v23, %v1029_v12 }
 0x4c9   : > { %v1613_v58 = vpop.eup %1612 }
 0x4ca   : > { %1125 = vmatprep.subr.bf16.mxu0 %v1093_v57  ;;  %v1026_v17 = vmul.f32 %v1613_v58, %v2295_v19  ;;  %v1025_v16 = vmul.f32 %v1613_v58, %v2293_v22  ;;  %v1375_v22 = vcombine.low %v2305_v14, %v2305_v14 }
 0x4cc   : > { %1058 = vst [vmem:[%s2079_s27 + $0x8] sm:$0xff] %v1026_v17  ;;  %1057 = vst [vmem:[%s2079_s27] sm:$0xff] %v1025_v16 }
 0x4cd   : > { %v1615_v28 = vpop.eup %1614 }
 0x4ce   : > { %v1028_v54 = vmul.f32 %v1615_v28, %v2301_v24  ;;  %v1027_v8 = vmul.f32 %v1615_v28, %v2299_v13 }
 0x4cf   : > { %1126 = vmatpush1.bf16.xpose.msra.mxu0 %v1092_v63 }
 0x4d0   : > { %1060 = vst [vmem:[%s2079_s27 + $0x18] sm:$0xff] %v1028_v54  ;;  %v1091_v44 = vpack.c.bf16 %v1028_v54, %v1026_v17  ;;  %1059 = vst [vmem:[%s2079_s27 + $0x10] sm:$0xff] %v1027_v8  ;;  %v1090_v19 = vpack.c.bf16 %v1027_v8, %v1025_v16  ;;  %s1678_s27 = scalar_lea.vmem %s1677_s26, 8192 }
 0x4d1   : > { %p1680_p1 = scmp.lt.s32.totalorder %s1678_s27, %s1672_s4 }
 0x4d2   : > { %1127 = vmatprep.subr.bf16.mxu0 %v1091_v44 }
 0x4d3   : > { %p1681_p11 = por %p1680_p1, %p1679_p3 }
 0x4d5   : > { %p1682_p7 = pnand %p1681_p11, %p1675_p2 }
 0x4d7   : > { %1128 = vmatpush1.bf16.xpose.msra.mxu0 %v1090_v19 }
 0x4de   : > { %1146 = vmatmul.mubr.bf16.vlgmr.msra.gmra.mxu0 %v1375_v22 }
 0x4df   : > { %1685 = shalt.err (!%p1682_p7)
}
 0x4e0   : > { %s1686_s13 = scalar_lea.hbm %s2383_s29, 4096  ;;  %s1690_s2 = scalar_lea.hbm %s2534_s14, 16384 }
 0x4e1   : > { %p1687_p8 = scmp.ne.s32.totalorder %s2383_s29, %s1686_s13  ;;  %p1691_p4 = scmp.lt.s32.totalorder %s2383_s29, %s2534_s14 }
 0x4e2   : > { %p1692_p10 = scmp.lt.s32.totalorder %s1690_s2, %s1686_s13 }
 0x4e3   : > { %p1688_p12 = pnand %p1687_p8, %p2535_p9 }
 0x4e4   : > { %p1693_p5 = por %p1692_p10, %p1691_p4 }
 0x4e5   : > { %p1689_p13 = pneg %p1688_p12 }
 0x4e7   : > { %p1694_p6 = pnand %p1693_p5, %p1689_p13 }
 0x4e9   : > { %1697 = shalt.err (!%p1694_p6)
}
 0x4ea   : > { %s1835_s7 = smov 256   ;;  %s1836_s4 = smov 16  }
 0x4eb   : > { %1403 = dma.vmem_to_hbm [thread:$0]  (%p2535_p9), %s2378_s21, 4096, %s2383_s29, %s1164_s3, %s1835_s7, %s1835_s7, %s1836_s4  }
 0x4ec   : > { %s1153_s10 = sld [smem:[#allocation4]]  ;;  %s1379_s26 = sshll.u32 %s2532_s18, 1 }
 0x4ed   : > { %s1175_s27 = sadd.s32 %s1810_s8, %s1379_s26  ;;  %s1179_s25 = sshll.u32 %s2077_s28, 4  ;;  %s2417_s25 = int_to_ptr.vmem [resolvable:$true] %s1179_s25 }
 0x4ee   : > { %s1380_s13 = sshll.u32 %s1175_s27, 7  ;;  %s2536_s6 = sld [smem:[#allocation29_spill]] }
 0x4ef   : > { %s1159_s8 = scalar_lea.sflag [#allocation7], %s2066_s30  ;;  %s1698_s18 = scalar_lea.vmem %s2417_s25, 128 }
 0x4f0   : > { %p1699_p0 = scmp.ne.s32.totalorder %s2417_s25, %s1698_s18  ;;  %s1837_s21 = smov [#allocation10]  }
 0x4f1   : > { %s1702_s29 = sshll.u32 %s1837_s21, 4  ;;  %s1703_s29 = int_to_ptr.vmem [resolvable:$false] %s1702_s29 }
 0x4f2   : > { %v1154_v13 = vstv %s1153_s10  ;;  %p1700_p2 = pnand %p1699_p0, %p2535_p9  ;;  %s1704_s3 = scalar_lea.vmem %s1703_s29, 256 }
 0x4f3   : > { %p1705_p1 = scmp.lt.s32.totalorder %s2417_s25, %s1703_s29  ;;  %p1706_p11 = scmp.lt.s32.totalorder %s1704_s3, %s1698_s18 }
 0x4f4   : > { %s2415_s0 = scalar_lea.hbm %s2536_s6, %s1380_s13  ;;  %p1701_p3 = pneg %p1700_p2 }
 0x4f5   : > { %p1707_p7 = por %p1706_p11, %p1705_p1 }
 0x4f7   : > { %p1708_p8 = pnand %p1707_p7, %p1701_p3 }
 0x59e   : > { %v1147_v24 = vpop.f32.mrf.mxu0 }
 0x59f   : > { %v1155_v14 = vmul.f32 %v1154_v13, %v1147_v24 }
 0x5a0   : > { %v1149_v45 = vpop.f32.mrf.mxu0 }
 0x5a1   : > { %v1156_v2 = vadd.f32 %v1155_v14, %v2095_v26 }
 0x5a2   : > { %v1150_v11 = vpop.f32.mrf.mxu0 }
 0x5a3   : > { %1157 = vst [vmem:[%s2077_s28] sm:$0xff] %v1156_v2 }
 0x5a4   : > { %v1151_v46 = vpop.f32.mrf.mxu0 }
 0x5a5   : > { %1711 = shalt.err (!%p1708_p8)
}
 0x5a6   : > { %s1712_s28 = scalar_lea.hbm %s2415_s0, 128  ;;  %s1716_s4 = scalar_lea.hbm %s2536_s6, 512 }
 0x5a7   : > { %p1713_p12 = scmp.ne.s32.totalorder %s2415_s0, %s1712_s28  ;;  %p1717_p10 = scmp.lt.s32.totalorder %s2415_s0, %s2536_s6 }
 0x5a8   : > { %p1718_p5 = scmp.lt.s32.totalorder %s1716_s4, %s1712_s28 }
 0x5a9   : > { %p1714_p13 = pnand %p1713_p12, %p2535_p9 }
 0x5aa   : > { %p1719_p6 = por %p1718_p5, %p1717_p10 }
 0x5ab   : > { %p1715_p4 = pneg %p1714_p13 }
 0x5ad   : > { %p1720_p0 = pnand %p1719_p6, %p1715_p4 }
 0x5af   : > { %1723 = shalt.err (!%p1720_p0)
}
 0x5b0   : > { %1402 = dma.vmem_to_hbm [thread:$0]  (%p2535_p9), %s2417_s25, 128, %s2415_s0, %s1159_s8  }
 0x5b1 PF: > { %s2537_s27 = sld [smem:[#allocation17_spill]]  ;;  %p1421_p2 = scmp.ge.s32.totalorder %s1826_s24, 2 }
 0x5b2   : > { %s2538_s13 = sld [smem:[#allocation22_spill]] }
 0x5b7   : > { %s1210_s11 = sand.u32 1, %s2537_s27  }
 0x5b8   : > { %p2539_p3 = scmp.ne.s32.totalorder %s2538_s13, 0  ;;  %s1211_s2 = scalar_lea.sflag [#allocation7], %s1210_s11 }
 0x5ba   : > { %p1414_p1 = pnand %p1421_p2, %p2539_p3 }
 0x5bc   : > { %p1415_p11 = pneg %p1414_p1 }
 0x5be   : > { %1777 = dma.done.wait (%p1415_p11), %s1211_s2, 128  }
 0x5bf   : > { %1779 = vsyncadd (%p1415_p11), %s1211_s2, 4294967168  ;;  %s1220_s18 = scalar_lea.sflag [#allocation12], %s1210_s11 }
 0x5c0   : > { %1781 = dma.done.wait (%p1415_p11), %s1220_s18, 4096  }
 0x5c1   : > { %1783 = vsyncadd (%p1415_p11), %s1220_s18, 4294963200  ;;  %s34_s24 = sadd.s32 1, %s1826_s24   ;;  %s2540_s9 = smov %s2039_s15 }
 0x5c2   : > { %p31_p7 = scmp.ge.s32.totalorder %s34_s24, 6   ;;  %s2541_s25 = sld [smem:[#allocation19_spill]] }
 0x5c3   : > { %s2542_s0 = sld [smem:[#allocation20_spill]]  ;;  %s2543_s15 = smov %s1790_s16 }
 0x5c4   : > { %s2544_s16 = smov %s1794_s17  ;;  %s2545_s17 = smov %s2540_s9 }
 0x5c5   : > { %s2546_s18 = smov %s1802_s19  ;;  %s2547_s19 = smov %s1806_s20 }
 0x5c6   : > { %s2548_s20 = smov %s2036_s12  ;;  %s2549_s8 = smov %s1818_s22 }
 0x5c7   : > { %s2550_s21 = smov %s1822_s23  ;;  %33 = sbr.rel (!%p31_p7) target bundleno = 23 (0x17), region = 135 }
 0x5c8   : > { %s2551_s22 = smov %s2541_s25 }
 0x5c9   : > { %s2552_s23 = smov %s2542_s0 }
 0x5cc   :  { %1225 = vsyncpa [#allocation6], 1 }
 0x5cd   :  { %1227 = vsyncpa [#allocation6 + $0x1], 1 }
 0x5ce   :  { %1228 = vsyncpa [#allocation9], 1 }
 0x5cf   :  { %1230 = vsyncpa [#allocation9 + $0x1], 1 }
 0x5d0   :  { %1231 = vsyncpa [#allocation7], 1 }
 0x5d1   :  { %1233 = vsyncpa [#allocation7 + $0x1], 1 }
 0x5d2   :  { %1234 = vsyncpa [#allocation12], 1 }
 0x5d3   :  { %1236 = vsyncpa [#allocation12 + $0x1], 1 }

</bundles_post_ra>
